<compile_context>
chip_gen: v7x
topology: tpu7x:2x2x1
jax: 0.10.0
libtpu: 0.0.40
codegen_flags: <defaults>
</compile_context>

<pallas_src>
import math

import jax
import jax.numpy as jnp
from jax.experimental import pallas as pl
from jax.experimental.pallas import tpu as pltpu

_LOG2 = math.log(2.0)


def _rup(x, m):
    return ((x + m - 1) // m) * m


def _ssp(x):
    # shifted softplus, numerically stable: softplus(x) - log(2)
    return jnp.maximum(x, 0.0) + jnp.log1p(jnp.exp(-jnp.abs(x))) - _LOG2


def energy_head_kernel(feat_ref, starts_ref, ends_ref, inv_n_ref,
                       w1_ref, b1_ref, w2_ref, b2_ref, w3_ref, b3_ref,
                       out_ref, acc_ref, iota_ref):
    """Grid over atom tiles: accumulate segment sums, finalize with the MLP."""
    step = pl.program_id(0)
    ta = feat_ref.shape[0]

    @pl.when(step == 0)
    def _():
        acc_ref[...] = jnp.zeros_like(acc_ref)
        # Atom-within-tile index, built once and reused by every tile.
        iota_ref[...] = jax.lax.broadcasted_iota(jnp.int32, iota_ref.shape, 1)

    # Membership mask: starts[g] <= step*ta + a < ends[g].  Shift the *ranges*
    # by the tile base (two tiny (G,1) int subtractions) instead of rebuilding
    # or offsetting a (G, TA) iota every step.
    base = step * ta
    lo = starts_ref[...] - base          # (G_pad, 1)
    hi = ends_ref[...] - base            # (G_pad, 1)
    idx = iota_ref[...]                  # (G_pad, TA)
    mask = ((idx >= lo) & (idx < hi)).astype(jnp.bfloat16)   # 0/1 exact in bf16

    # Segment-sum for this atom tile on the MXU, accumulate in f32.
    acc_ref[...] += jnp.dot(mask, feat_ref[...],
                            preferred_element_type=jnp.float32)

    @pl.when(step == pl.num_programs(0) - 1)
    def _():
        # mean = sum * (1/n); padding graphs have inv_n == 0.
        agg = acc_ref[...] * inv_n_ref[...]
        h = _ssp(jnp.dot(agg, w1_ref[...],
                         preferred_element_type=jnp.float32) + b1_ref[...])
        h = _ssp(jnp.dot(h, w2_ref[...],
                         preferred_element_type=jnp.float32) + b2_ref[...])
        out = jnp.dot(h, w3_ref[...],
                      preferred_element_type=jnp.float32) + b3_ref[...]
        out_ref[...] = out.astype(out_ref.dtype)


def prepare_energy_head(params):
    """Pad MLP weights/biases to lane/sublane-dense shapes ONCE (cache this)."""
    w1, b1, w2, b2, w3, b3 = params
    latent_dim, hidden = w1.shape
    D_pad = _rup(latent_dim, 128)
    H_pad = _rup(hidden, 128)
    OUT_pad = 128                       # lane-dense output slab (unmasked stores)

    # ssp(0) == 0, so zero-padded weight columns keep padded activation
    # columns exactly zero through the whole MLP.
    w1p = jnp.zeros((D_pad, H_pad), jnp.float32).at[:latent_dim, :hidden].set(w1)
    b1p = jnp.zeros((1, H_pad), jnp.float32).at[:, :hidden].set(b1)
    w2p = jnp.zeros((H_pad, H_pad), jnp.float32).at[:hidden, :hidden].set(w2)
    b2p = jnp.zeros((1, H_pad), jnp.float32).at[:, :hidden].set(b2)
    w3p = jnp.zeros((H_pad, OUT_pad), jnp.float32).at[:hidden, :1].set(w3)
    b3p = jnp.zeros((1, OUT_pad), jnp.float32).at[:, :1].set(b3)
    return {
        "weights": (w1p, b1p, w2p, b2p, w3p, b3p),
        "latent_dim": latent_dim, "hidden": hidden,
        "D_pad": D_pad, "H_pad": H_pad, "OUT_pad": OUT_pad,
    }


def _choose_atom_tiling(n_atoms, d_pad, max_atom_tile):
    """Pick (TA, A_pad): big tiles (DMA >> per-step overhead), bounded padding."""
    # Cap the tile so a double-buffered bf16 feat block stays ~<= 8 MiB.
    vmem_cap = max(512, ((4 << 20) // (2 * d_pad)) // 512 * 512)
    max_tile = min(max_atom_tile, vmem_cap)
    if n_atoms <= max_tile:
        ta = _rup(max(n_atoms, 1), 16)          # bf16 packed-sublane quantum
        return ta, ta
    n_tiles = -(-n_atoms // max_tile)           # cdiv
    ta = _rup(-(-n_atoms // n_tiles), 512)      # waste < 512 rows per tile
    return ta, ta * n_tiles


def energy_head_forward(node_features, n_node, prepared, *, max_atom_tile=8192):
    """node_features: (n_atoms, latent_dim); n_node: (n_graphs,) int32."""
    n_atoms, latent_dim = node_features.shape
    assert latent_dim == prepared["latent_dim"]
    n_graphs = n_node.shape[0]
    D_pad, H_pad, OUT_pad = prepared["D_pad"], prepared["H_pad"], prepared["OUT_pad"]
    w1p, b1p, w2p, b2p, w3p, b3p = prepared["weights"]

    G_pad = _rup(max(n_graphs, 1), 8)           # sublane-dense graph axis
    TA, A_pad = _choose_atom_tiling(n_atoms, D_pad, max_atom_tile)

    # --- host-side glue (kept minimal) -------------------------------------
    # Dominant HBM stream: cast to bf16 (no-op if the producer already emits
    # bf16) and pad only when dims are misaligned; cast+pad fuse to one pass.
    # TODO(synk): have the upstream model emit bf16, lane-aligned features so
    # this becomes a pure pass-through.
    feat = node_features
    if feat.dtype != jnp.bfloat16:
        feat = feat.astype(jnp.bfloat16)
    pad_a, pad_d = A_pad - n_atoms, D_pad - latent_dim
    if pad_a or pad_d:
        # Zero-padded rows are load-bearing: they keep the accumulator finite.
        feat = jnp.pad(feat, ((0, pad_a), (0, pad_d)))

    # Per-graph [start, end) atom ranges; padded graphs get an empty range,
    # padded atoms fall outside every range (so they never contribute).
    n = n_node.astype(jnp.int32)
    ends = jnp.cumsum(n)
    starts = ends - n
    starts_p = jnp.zeros((G_pad, 1), jnp.int32).at[:n_graphs, 0].set(starts)
    ends_p = jnp.zeros((G_pad, 1), jnp.int32).at[:n_graphs, 0].set(ends)
    inv_n = jnp.where(n > 0, 1.0 / n.astype(jnp.float32), 0.0)
    inv_n_p = jnp.zeros((G_pad, 1), jnp.float32).at[:n_graphs, 0].set(inv_n)

    # Resident (fetched-once) blocks: constant index map + single buffer.
    def resident(shape):
        return pl.BlockSpec(shape, lambda i: (0, 0), pipeline_mode=pl.Buffered(1))

    # VMEM actually needed (+headroom) — don't claim the whole chip (v7x!).
    need = (2 * TA * D_pad * 2                                  # feat, 2 bufs, bf16
            + G_pad * D_pad * 4                                 # acc scratch
            + G_pad * max(TA, 128) * 4                          # iota scratch
            + (D_pad * H_pad + H_pad * H_pad + H_pad * OUT_pad) * 4
            + 3 * 8 * max(H_pad, OUT_pad) * 4                   # biases (padded)
            + 3 * G_pad * 128 * 4                               # starts/ends/inv_n
            + 2 * G_pad * OUT_pad * 4)                          # output
    vmem_limit = min(int(need * 1.5) + (4 << 20), 64 << 20)

    out = pl.pallas_call(
        energy_head_kernel,
        out_shape=jax.ShapeDtypeStruct((G_pad, OUT_pad), jnp.float32),
        grid_spec=pltpu.PrefetchScalarGridSpec(
            num_scalar_prefetch=0,
            grid=(A_pad // TA,),
            in_specs=[
                pl.BlockSpec((TA, D_pad), lambda i: (i, 0)),    # node features (streamed)
                resident((G_pad, 1)),                           # segment starts
                resident((G_pad, 1)),                           # segment ends
                resident((G_pad, 1)),                           # 1 / n_node
                resident((D_pad, H_pad)),                       # w1
                resident((1, H_pad)),                           # b1
                resident((H_pad, H_pad)),                       # w2
                resident((1, H_pad)),                           # b2
                resident((H_pad, OUT_pad)),                     # w3
                resident((1, OUT_pad)),                         # b3
            ],
            out_specs=pl.BlockSpec((G_pad, OUT_pad), lambda i: (0, 0),
                                   pipeline_mode=pl.Buffered(1)),
            scratch_shapes=[pltpu.VMEM((G_pad, D_pad), jnp.float32),   # acc
                            pltpu.VMEM((G_pad, TA), jnp.int32)],       # iota
        ),
        compiler_params=pltpu.CompilerParams(
            dimension_semantics=("arbitrary",),     # atom axis is a reduction
            vmem_limit_bytes=vmem_limit,
        ),
    )(feat, starts_p, ends_p, inv_n_p, w1p, b1p, w2p, b2p, w3p, b3p)

    return out[:n_graphs, :1]


def init_params(key, latent_dim, hidden_dim):
    """Deterministic synthetic weights (shapes match EnergyHead's build_mlp)."""
    ks = jax.random.split(key, 6)

    def lin(kw, fan_in, fan_out):
        bound = 1.0 / math.sqrt(fan_in)
        return jax.random.uniform(kw, (fan_in, fan_out), jnp.float32, -bound, bound)

    w1 = lin(ks[0], latent_dim, hidden_dim)
    b1 = jax.random.uniform(ks[1], (1, hidden_dim), jnp.float32, -0.1, 0.1)
    w2 = lin(ks[2], hidden_dim, hidden_dim)
    b2 = jax.random.uniform(ks[3], (1, hidden_dim), jnp.float32, -0.1, 0.1)
    w3 = lin(ks[4], hidden_dim, 1)
    b3 = jax.random.uniform(ks[5], (1, 1), jnp.float32, -0.1, 0.1)
    return (w1, b1, w2, b2, w3, b3)


def reference_forward(node_features, n_node, params):
    """Pure-JAX f32 reference for correctness check."""
    n_graphs = n_node.shape[0]
    n_atoms = node_features.shape[0]
    segment_ids = jnp.repeat(jnp.arange(n_graphs), n_node,
                             total_repeat_length=n_atoms)
    sums = jax.ops.segment_sum(node_features, segment_ids,
                               num_segments=n_graphs)
    agg = sums / n_node[:, None].astype(jnp.float32)
    w1, b1, w2, b2, w3, b3 = params
    ssp = lambda x: jax.nn.softplus(x) - jnp.log(2.0)
    h = ssp(agg @ w1 + b1)
    h = ssp(h @ w2 + b2)
    return h @ w3 + b3


if __name__ == "__main__":
    # small shapes consistent with the module:
    # latent_dim=32, num_mlp_layers=2, mlp_hidden_dim=32
    latent_dim, hidden_dim = 32, 32
    n_graphs = 2
    n_node = jnp.array([3, 5], dtype=jnp.int32)   # 8 atoms across 2 graphs
    n_atoms = 8

    key = jax.random.PRNGKey(0)
    k_feat, k_param = jax.random.split(key)
    node_features = jax.random.normal(k_feat, (n_atoms, latent_dim), jnp.float32)
    params = init_params(k_param, latent_dim, hidden_dim)

    prepared = prepare_energy_head(params)        # pad/cache weights once
    pred = energy_head_forward(node_features, n_node, prepared)
    pred = jax.block_until_ready(pred)

    ref = reference_forward(node_features, n_node, params)
    assert pred.shape == (n_graphs, 1), pred.shape
    # node_features are streamed in bf16 (f32 accumulation), so allow bf16-level
    # rounding relative to the pure-f32 reference.
    assert jnp.allclose(pred, ref, atol=1e-2, rtol=1e-2), (pred, ref)

    print("KERNEL_OK")
</pallas_src>

<mosaic_0001>
module attributes {stable_mosaic.version = 11 : i64} {
  func.func @energy_head_kernel(%arg0: i32, %arg1: memref<16x128xbf16, #tpu.memory_space<vmem>>, %arg2: memref<8x1xi32, #tpu.memory_space<vmem>>, %arg3: memref<8x1xi32, #tpu.memory_space<vmem>>, %arg4: memref<8x1xf32, #tpu.memory_space<vmem>>, %arg5: memref<128x128xf32, #tpu.memory_space<vmem>>, %arg6: memref<1x128xf32, #tpu.memory_space<vmem>>, %arg7: memref<128x128xf32, #tpu.memory_space<vmem>>, %arg8: memref<1x128xf32, #tpu.memory_space<vmem>>, %arg9: memref<128x128xf32, #tpu.memory_space<vmem>>, %arg10: memref<1x128xf32, #tpu.memory_space<vmem>>, %arg11: memref<8x128xf32, #tpu.memory_space<vmem>>, %arg12: memref<8x128xf32, #tpu.memory_space<vmem>>, %arg13: memref<8x16xi32, #tpu.memory_space<vmem>>) attributes {dimension_semantics = [#tpu.dimension_semantics<arbitrary>], iteration_bounds = array<i64: 1>, scalar_prefetch = 0 : i64, scratch_operands = 2 : i64, tpu.core_type = #tpu.core_type<tc>, window_params = [{transform_indices = @transform_0, window_bounds = array<i64: 16, 128>}, {pipeline_mode = #tpu.pipeline_mode<synchronous>, transform_indices = @transform_1, window_bounds = array<i64: 8, 1>}, {pipeline_mode = #tpu.pipeline_mode<synchronous>, transform_indices = @transform_2, window_bounds = array<i64: 8, 1>}, {pipeline_mode = #tpu.pipeline_mode<synchronous>, transform_indices = @transform_3, window_bounds = array<i64: 8, 1>}, {pipeline_mode = #tpu.pipeline_mode<synchronous>, transform_indices = @transform_4, window_bounds = array<i64: 128, 128>}, {pipeline_mode = #tpu.pipeline_mode<synchronous>, transform_indices = @transform_5, window_bounds = array<i64: 1, 128>}, {pipeline_mode = #tpu.pipeline_mode<synchronous>, transform_indices = @transform_6, window_bounds = array<i64: 128, 128>}, {pipeline_mode = #tpu.pipeline_mode<synchronous>, transform_indices = @transform_7, window_bounds = array<i64: 1, 128>}, {pipeline_mode = #tpu.pipeline_mode<synchronous>, transform_indices = @transform_8, window_bounds = array<i64: 128, 128>}, {pipeline_mode = #tpu.pipeline_mode<synchronous>, transform_indices = @transform_9, window_bounds = array<i64: 1, 128>}, {pipeline_mode = #tpu.pipeline_mode<synchronous>, transform_indices = @transform_10, window_bounds = array<i64: 8, 128>}]} {
    %c0_i32 = arith.constant 0 : i32
    %0 = arith.cmpi eq, %arg0, %c0_i32 : i32
    %1 = arith.extui %0 : i1 to i32
    %c0_i32_0 = arith.constant 0 : i32
    %2 = arith.cmpi ne, %1, %c0_i32_0 : i32
    scf.if %2 {
      %cst_14 = arith.constant 0.000000e+00 : f32
      %27 = vector.broadcast %cst_14 : f32 to vector<8x128xf32>
      %c0_15 = arith.constant 0 : index
      %c0_16 = arith.constant 0 : index
      %28 = vector.load %arg12[%c0_15, %c0_16] : memref<8x128xf32, #tpu.memory_space<vmem>>, vector<8x128xf32>
      tpu.vector_store %arg12[%c0_15, %c0_16], %27 {strides = array<i32>} : memref<8x128xf32, #tpu.memory_space<vmem>>, vector<8x128xf32>,
      %29 = tpu.iota {dimensions = array<i32: 1>} : vector<8x16xi32>
      %c0_17 = arith.constant 0 : index
      %c0_18 = arith.constant 0 : index
      %30 = vector.load %arg13[%c0_17, %c0_18] : memref<8x16xi32, #tpu.memory_space<vmem>>, vector<8x16xi32>
      tpu.vector_store %arg13[%c0_17, %c0_18], %29 {strides = array<i32>} : memref<8x16xi32, #tpu.memory_space<vmem>>, vector<8x16xi32>,
    } else {
    }
    %c16_i32 = arith.constant 16 : i32
    %3 = arith.muli %arg0, %c16_i32 : i32
    %c0 = arith.constant 0 : index
    %c0_1 = arith.constant 0 : index
    %4 = vector.load %arg2[%c0, %c0_1] : memref<8x1xi32, #tpu.memory_space<vmem>>, vector<8x1xi32>
    %5 = vector.broadcast %3 : i32 to vector<8x1xi32>
    %6 = arith.subi %4, %5 : vector<8x1xi32>
    %c0_2 = arith.constant 0 : index
    %c0_3 = arith.constant 0 : index
    %7 = vector.load %arg3[%c0_2, %c0_3] : memref<8x1xi32, #tpu.memory_space<vmem>>, vector<8x1xi32>
    %8 = vector.broadcast %3 : i32 to vector<8x1xi32>
    %9 = arith.subi %7, %8 : vector<8x1xi32>
    %c0_4 = arith.constant 0 : index
    %c0_5 = arith.constant 0 : index
    %10 = vector.load %arg13[%c0_4, %c0_5] : memref<8x16xi32, #tpu.memory_space<vmem>>, vector<8x16xi32>
    %11 = vector.broadcast %6 : vector<8x1xi32> to vector<8x16xi32>
    %12 = arith.cmpi sge, %10, %11 : vector<8x16xi32>
    %13 = vector.broadcast %9 : vector<8x1xi32> to vector<8x16xi32>
    %14 = arith.cmpi slt, %10, %13 : vector<8x16xi32>
    %15 = arith.andi %12, %14 : vector<8x16xi1>
    %16 = arith.extui %15 : vector<8x16xi1> to vector<8x16xi32>
    %17 = arith.sitofp %16 : vector<8x16xi32> to vector<8x16xf32>
    %18 = arith.truncf %17 : vector<8x16xf32> to vector<8x16xbf16>
    %c0_6 = arith.constant 0 : index
    %c0_7 = arith.constant 0 : index
    %19 = vector.load %arg12[%c0_6, %c0_7] : memref<8x128xf32, #tpu.memory_space<vmem>>, vector<8x128xf32>
    %c0_8 = arith.constant 0 : index
    %c0_9 = arith.constant 0 : index
    %20 = vector.load %arg1[%c0_8, %c0_9] : memref<16x128xbf16, #tpu.memory_space<vmem>>, vector<16x128xbf16>
    %cst = arith.constant dense<0.000000e+00> : vector<8x128xf32>
    %21 = tpu.matmul %18, %20, %cst {dimension_numbers = #tpu.dot_dimension_numbers<[1], [0], [0], [1], [0, 0, 1, 1], [], []>} : vector<8x16xbf16>, vector<16x128xbf16>, vector<8x128xf32> -> vector<8x128xf32>
    %22 = arith.addf %19, %21 : vector<8x128xf32>
    %c0_10 = arith.constant 0 : index
    %c0_11 = arith.constant 0 : index
    %23 = vector.load %arg12[%c0_10, %c0_11] : memref<8x128xf32, #tpu.memory_space<vmem>>, vector<8x128xf32>
    tpu.vector_store %arg12[%c0_10, %c0_11], %22 {strides = array<i32>} : memref<8x128xf32, #tpu.memory_space<vmem>>, vector<8x128xf32>,
    %c0_i32_12 = arith.constant 0 : i32
    %24 = arith.cmpi eq, %arg0, %c0_i32_12 : i32
    %25 = arith.extui %24 : i1 to i32
    %c0_i32_13 = arith.constant 0 : i32
    %26 = arith.cmpi ne, %25, %c0_i32_13 : i32
    scf.if %26 {
      %c0_14 = arith.constant 0 : index
      %c0_15 = arith.constant 0 : index
      %27 = vector.load %arg12[%c0_14, %c0_15] : memref<8x128xf32, #tpu.memory_space<vmem>>, vector<8x128xf32>
      %c0_16 = arith.constant 0 : index
      %c0_17 = arith.constant 0 : index
      %28 = vector.load %arg4[%c0_16, %c0_17] : memref<8x1xf32, #tpu.memory_space<vmem>>, vector<8x1xf32>
      %29 = vector.broadcast %28 : vector<8x1xf32> to vector<8x128xf32>
      %30 = arith.mulf %27, %29 : vector<8x128xf32>
      %c0_18 = arith.constant 0 : index
      %c0_19 = arith.constant 0 : index
      %31 = vector.load %arg5[%c0_18, %c0_19] : memref<128x128xf32, #tpu.memory_space<vmem>>, vector<128x128xf32>
      %cst_20 = arith.constant dense<0.000000e+00> : vector<8x128xf32>
      %32 = tpu.matmul %30, %31, %cst_20 {dimension_numbers = #tpu.dot_dimension_numbers<[1], [0], [0], [1], [0, 0, 1, 1], [], []>} : vector<8x128xf32>, vector<128x128xf32>, vector<8x128xf32> -> vector<8x128xf32>
      %c0_21 = arith.constant 0 : index
      %c0_22 = arith.constant 0 : index
      %33 = vector.load %arg6[%c0_21, %c0_22] : memref<1x128xf32, #tpu.memory_space<vmem>>, vector<1x128xf32>
      %34 = vector.broadcast %33 : vector<1x128xf32> to vector<8x128xf32>
      %35 = arith.addf %32, %34 : vector<8x128xf32>
      %cst_23 = arith.constant 0.000000e+00 : f32
      %36 = vector.broadcast %cst_23 : f32 to vector<8x128xf32>
      %37 = arith.maximumf %35, %36 : vector<8x128xf32>
      %38 = math.absf %35 : vector<8x128xf32>
      %cst_24 = arith.constant 0.000000e+00 : f32
      %39 = vector.broadcast %cst_24 : f32 to vector<8x128xf32>
      %40 = arith.subf %39, %38 : vector<8x128xf32>
      %41 = math.exp %40 : vector<8x128xf32>
      %42 = math.log1p %41 : vector<8x128xf32>
      %43 = arith.addf %37, %42 : vector<8x128xf32>
      %cst_25 = arith.constant 0.693147182 : f32
      %44 = vector.broadcast %cst_25 : f32 to vector<8x128xf32>
      %45 = arith.subf %43, %44 : vector<8x128xf32>
      %c0_26 = arith.constant 0 : index
      %c0_27 = arith.constant 0 : index
      %46 = vector.load %arg7[%c0_26, %c0_27] : memref<128x128xf32, #tpu.memory_space<vmem>>, vector<128x128xf32>
      %cst_28 = arith.constant dense<0.000000e+00> : vector<8x128xf32>
      %47 = tpu.matmul %45, %46, %cst_28 {dimension_numbers = #tpu.dot_dimension_numbers<[1], [0], [0], [1], [0, 0, 1, 1], [], []>} : vector<8x128xf32>, vector<128x128xf32>, vector<8x128xf32> -> vector<8x128xf32>
      %c0_29 = arith.constant 0 : index
      %c0_30 = arith.constant 0 : index
      %48 = vector.load %arg8[%c0_29, %c0_30] : memref<1x128xf32, #tpu.memory_space<vmem>>, vector<1x128xf32>
      %49 = vector.broadcast %48 : vector<1x128xf32> to vector<8x128xf32>
      %50 = arith.addf %47, %49 : vector<8x128xf32>
      %cst_31 = arith.constant 0.000000e+00 : f32
      %51 = vector.broadcast %cst_31 : f32 to vector<8x128xf32>
      %52 = arith.maximumf %50, %51 : vector<8x128xf32>
      %53 = math.absf %50 : vector<8x128xf32>
      %cst_32 = arith.constant 0.000000e+00 : f32
      %54 = vector.broadcast %cst_32 : f32 to vector<8x128xf32>
      %55 = arith.subf %54, %53 : vector<8x128xf32>
      %56 = math.exp %55 : vector<8x128xf32>
      %57 = math.log1p %56 : vector<8x128xf32>
      %58 = arith.addf %52, %57 : vector<8x128xf32>
      %cst_33 = arith.constant 0.693147182 : f32
      %59 = vector.broadcast %cst_33 : f32 to vector<8x128xf32>
      %60 = arith.subf %58, %59 : vector<8x128xf32>
      %c0_34 = arith.constant 0 : index
      %c0_35 = arith.constant 0 : index
      %61 = vector.load %arg9[%c0_34, %c0_35] : memref<128x128xf32, #tpu.memory_space<vmem>>, vector<128x128xf32>
      %cst_36 = arith.constant dense<0.000000e+00> : vector<8x128xf32>
      %62 = tpu.matmul %60, %61, %cst_36 {dimension_numbers = #tpu.dot_dimension_numbers<[1], [0], [0], [1], [0, 0, 1, 1], [], []>} : vector<8x128xf32>, vector<128x128xf32>, vector<8x128xf32> -> vector<8x128xf32>
      %c0_37 = arith.constant 0 : index
      %c0_38 = arith.constant 0 : index
      %63 = vector.load %arg10[%c0_37, %c0_38] : memref<1x128xf32, #tpu.memory_space<vmem>>, vector<1x128xf32>
      %64 = vector.broadcast %63 : vector<1x128xf32> to vector<8x128xf32>
      %65 = arith.addf %62, %64 : vector<8x128xf32>
      %c0_39 = arith.constant 0 : index
      %c0_40 = arith.constant 0 : index
      %66 = vector.load %arg11[%c0_39, %c0_40] : memref<8x128xf32, #tpu.memory_space<vmem>>, vector<8x128xf32>
      tpu.vector_store %arg11[%c0_39, %c0_40], %65 {strides = array<i32>} : memref<8x128xf32, #tpu.memory_space<vmem>>, vector<8x128xf32>,
    } else {
    }
    return
  }
  func.func @transform_0(%arg0: i32) -> (i32, i32) {
    %c0_i32 = arith.constant 0 : i32
    %c0_i32_0 = arith.constant 0 : i32
    return %arg0, %c0_i32 : i32, i32
  }
  func.func @transform_1(%arg0: i32) -> (i32, i32) {
    %c0_i32 = arith.constant 0 : i32
    %c0_i32_0 = arith.constant 0 : i32
    %c0_i32_1 = arith.constant 0 : i32
    return %c0_i32, %c0_i32_0 : i32, i32
  }
  func.func @transform_2(%arg0: i32) -> (i32, i32) {
    %c0_i32 = arith.constant 0 : i32
    %c0_i32_0 = arith.constant 0 : i32
    %c0_i32_1 = arith.constant 0 : i32
    return %c0_i32, %c0_i32_0 : i32, i32
  }
  func.func @transform_3(%arg0: i32) -> (i32, i32) {
    %c0_i32 = arith.constant 0 : i32
    %c0_i32_0 = arith.constant 0 : i32
    %c0_i32_1 = arith.constant 0 : i32
    return %c0_i32, %c0_i32_0 : i32, i32
  }
  func.func @transform_4(%arg0: i32) -> (i32, i32) {
    %c0_i32 = arith.constant 0 : i32
    %c0_i32_0 = arith.constant 0 : i32
    %c0_i32_1 = arith.constant 0 : i32
    return %c0_i32, %c0_i32_0 : i32, i32
  }
  func.func @transform_5(%arg0: i32) -> (i32, i32) {
    %c0_i32 = arith.constant 0 : i32
    %c0_i32_0 = arith.constant 0 : i32
    %c0_i32_1 = arith.constant 0 : i32
    return %c0_i32, %c0_i32_0 : i32, i32
  }
  func.func @transform_6(%arg0: i32) -> (i32, i32) {
    %c0_i32 = arith.constant 0 : i32
    %c0_i32_0 = arith.constant 0 : i32
    %c0_i32_1 = arith.constant 0 : i32
    return %c0_i32, %c0_i32_0 : i32, i32
  }
  func.func @transform_7(%arg0: i32) -> (i32, i32) {
    %c0_i32 = arith.constant 0 : i32
    %c0_i32_0 = arith.constant 0 : i32
    %c0_i32_1 = arith.constant 0 : i32
    return %c0_i32, %c0_i32_0 : i32, i32
  }
  func.func @transform_8(%arg0: i32) -> (i32, i32) {
    %c0_i32 = arith.constant 0 : i32
    %c0_i32_0 = arith.constant 0 : i32
    %c0_i32_1 = arith.constant 0 : i32
    return %c0_i32, %c0_i32_0 : i32, i32
  }
  func.func @transform_9(%arg0: i32) -> (i32, i32) {
    %c0_i32 = arith.constant 0 : i32
    %c0_i32_0 = arith.constant 0 : i32
    %c0_i32_1 = arith.constant 0 : i32
    return %c0_i32, %c0_i32_0 : i32, i32
  }
  func.func @transform_10(%arg0: i32) -> (i32, i32) {
    %c0_i32 = arith.constant 0 : i32
    %c0_i32_0 = arith.constant 0 : i32
    %c0_i32_1 = arith.constant 0 : i32
    return %c0_i32, %c0_i32_0 : i32, i32
  }
}

</mosaic_0001>

<bundles_post_ra>
// kernel: tpu_custom_call.1
= control target key start
LH: loop header
LB: loop body
LE: loop exit
PB: predicated region body
PF: predicated region fallthrough
CT: control target
= control target key end

     0   :  { %15 = vsyncpa [#allocation5], 0  ;;  %s1045_s0 = inlined_call_operand.vmem [shape: bf16[16,128], index: 0, kind: input, shape index: {}]   ;;  %s1046_s1 = inlined_call_operand.vmem [shape: s32[8,1], index: 1, kind: input, shape index: {}]   ;;  %s1047_s2 = inlined_call_operand.vmem [shape: s32[8,1], index: 2, kind: input, shape index: {}]   ;;  %s1048_s3 = inlined_call_operand.vmem [shape: f32[8,1], index: 3, kind: input, shape index: {}]   ;;  %s1049_s4 = inlined_call_operand.hbm [shape: f32[128,128], index: 4, kind: input, shape index: {}]   ;;  %s1050_s5 = inlined_call_operand.vmem [shape: f32[1,128], index: 5, kind: input, shape index: {}]   ;;  %s1051_s6 = inlined_call_operand.hbm [shape: f32[128,128], index: 6, kind: input, shape index: {}]   ;;  %s1052_s7 = inlined_call_operand.vmem [shape: f32[1,128], index: 7, kind: input, shape index: {}]   ;;  %s1053_s8 = inlined_call_operand.hbm [shape: f32[128,128], index: 8, kind: input, shape index: {}]   ;;  %s1054_s9 = inlined_call_operand.vmem [shape: f32[1,128], index: 9, kind: input, shape index: {}]   ;;  %s1055_s10 = inlined_call_operand.hbm [shape: f32[8,128], index: 10, kind: output, shape index: {}]  }
   0x1   :  { %16 = vsyncpa [#allocation8], 0 }
   0x2   :  { %17 = vsyncpa [#allocation6], 0  ;;  %s859_s13 = smov [#allocation7]   ;;  %s860_s15 = smov [#allocation4]  }
   0x3   :  { %s45_s14 = sshll.u32 %s859_s13, 4  ;;  %s31_s16 = sshll.u32 %s860_s15, 4  ;;  %s46_s14 = int_to_ptr.vmem [resolvable:$true] %s45_s14  ;;  %s924_s16 = int_to_ptr.vmem [resolvable:$true] %s31_s16 }
   0x4   :  { %s765_s19 = scalar_lea.hbm %s1051_s6, 2048 }
   0x5   :  { %p766_p0 = scmp.ne.s32.totalorder %s1051_s6, %s765_s19  ;;  %p769_p1 = scmp.lt.u32.totalorder %s765_s19, %s1051_s6 }
   0x7   :  { %p771_p2 = pnand %p769_p1, %p766_p0 }
   0x9   :  { %774 = shalt.err (!%p771_p2)
}
   0xa   :  { %s775_s24 = scalar_lea.vmem %s46_s14, 2048  ;;  %p780_p4 = scmp.lt.s32.totalorder %s46_s14, %s46_s14 }
   0xb   :  { %p776_p3 = scmp.ne.s32.totalorder %s46_s14, %s775_s24  ;;  %p781_p5 = scmp.lt.s32.totalorder %s775_s24, %s775_s24 }
   0xd   :  { %p782_p6 = por %p781_p5, %p780_p4 }
   0xf   :  { %p783_p7 = pnand %p782_p6, %p776_p3 }
  0x11   :  { %786 = shalt.err (!%p783_p7)
}
  0x12   :  { %s861_s25 = smov 128   ;;  %s862_s26 = smov 8  }
  0x13   :  { %51 = dma.hbm_to_vmem [thread:$0]  %s1051_s6, 2048, %s46_s14, [#allocation8], %s861_s25, %s861_s25, %s862_s26  }
  0x14   :  { %s787_s11 = scalar_lea.hbm %s1049_s4, 2048 }
  0x15   :  { %p788_p8 = scmp.ne.s32.totalorder %s1049_s4, %s787_s11  ;;  %p791_p9 = scmp.lt.u32.totalorder %s787_s11, %s1049_s4 }
  0x17   :  { %p793_p10 = pnand %p791_p9, %p788_p8 }
  0x19   :  { %796 = shalt.err (!%p793_p10)
}
  0x1a   :  { %s797_s18 = scalar_lea.vmem %s924_s16, 2048  ;;  %p802_p12 = scmp.lt.s32.totalorder %s924_s16, %s924_s16 }
  0x1b   :  { %p798_p11 = scmp.ne.s32.totalorder %s924_s16, %s797_s18  ;;  %p803_p13 = scmp.lt.s32.totalorder %s797_s18, %s797_s18 }
  0x1d   :  { %p804_p0 = por %p803_p13, %p802_p12 }
  0x1f   :  { %p805_p1 = pnand %p804_p0, %p798_p11 }
  0x21   :  { %808 = shalt.err (!%p805_p1)
}
  0x22   :  { %37 = dma.hbm_to_vmem [thread:$0]  %s1049_s4, 2048, %s924_s16, [#allocation5], %s861_s25, %s861_s25, %s862_s26  }
  0x23   :  { %s863_s19 = smov [#allocation9]   ;;  %s809_s23 = scalar_lea.hbm %s1053_s8, 2048 }
  0x24   :  { %s59_s20 = sshll.u32 %s863_s19, 4  ;;  %p810_p2 = scmp.ne.s32.totalorder %s1053_s8, %s809_s23  ;;  %s60_s20 = int_to_ptr.vmem [resolvable:$true] %s59_s20 }
  0x25   :  { %p813_p3 = scmp.lt.u32.totalorder %s809_s23, %s1053_s8 }
  0x27   :  { %p815_p4 = pnand %p813_p3, %p810_p2 }
  0x29   :  { %818 = shalt.err (!%p815_p4)
}
  0x2a   :  { %s819_s30 = scalar_lea.vmem %s60_s20, 2048  ;;  %p824_p6 = scmp.lt.s32.totalorder %s60_s20, %s60_s20 }
  0x2b   :  { %p820_p5 = scmp.ne.s32.totalorder %s60_s20, %s819_s30  ;;  %p825_p7 = scmp.lt.s32.totalorder %s819_s30, %s819_s30 }
  0x2d   :  { %p826_p8 = por %p825_p7, %p824_p6 }
  0x2f   :  { %p827_p9 = pnand %p826_p8, %p820_p5 }
  0x31   :  { %830 = shalt.err (!%p827_p9)
}
  0x32   :  { %65 = dma.hbm_to_vmem [thread:$0]  %s1053_s8, 2048, %s60_s20, [#allocation8], %s861_s25, %s861_s25, %s862_s26  }
  0x33   :  { %853 = dma.done.wait [#allocation5], 2048  }
  0x34   :  { %854 = vsyncadd [#allocation5], 4294965248 }
  0x35   :  { %855 = dma.done.wait [#allocation8], 4096  }
  0x36   :  { %856 = vsyncadd [#allocation8], 4294963200  ;;  %v83_v0 = vlaneseq  ;;  %v864_v1 = vmov 0   ;;  %vm85_vm0 = vcmask 130048   ;;  %v88_v3 = vld [vmem:[%s1046_s1] sm:$0xff]  ;;  %v865_v5 = vmov 0.0  }
  0x37   :  { %754 = vset.pattern.permute.xlu0 %v864_v1  ;;  %755 = vset.pattern.permute.xlu1 %v864_v1  ;;  %v91_v4 = vld [vmem:[%s1047_s2] sm:$0xff]  ;;  %vm866_vm1 = vmmov 0   ;;  %v172_v8 = vld [vmem:[#allocation4] sm:$0xff]  ;;  %v173_v9 = vld [vmem:[#allocation4 + $0x8] sm:$0xff]  ;;  %v867_v10 = vmov 0.0|0.0   ;;  %s868_s18 = smov [#allocation10]  }
  0x38   :  { %v84_v2 = vand.u32 127, %v83_v0  ;;  %95 = vperm.xlu0 %754, %v88_v3   ;;  %561 = vmatprep.subr.bf16.mxu0 %v865_v5  ;;  %v756_v6 = vld [vmem:[%s1045_s0] sm:$0xff]   ;;  %v673_v11 = vpack.c.bf16 %v173_v9, %v172_v8  ;;  %v174_v12 = vld [vmem:[#allocation4 + $0x10] sm:$0xff]  ;;  %v176_v15 = vld [vmem:[#allocation4 + $0x20] sm:$0xff]  ;;  %s490_s6 = sshll.u32 %s868_s18, 4  ;;  %s491_s6 = int_to_ptr.vmem [resolvable:$true] %s490_s6 }
  0x39   :  { %562 = vmatpush3.bf16.msra.mxu0 %v756_v6  ;;  %563 = vmatprep.mubr.msk.bf16.mxu0 %vm866_vm1, %v865_v5  ;;  %v165_v7 = vld [vmem:[%s1048_s3] sm:$0xff]  ;;  %v177_v16 = vld [vmem:[#allocation4 + $0x28] sm:$0xff]  ;;  %v178_v18 = vld [vmem:[#allocation4 + $0x30] sm:$0xff]  ;;  %s831_s14 = scalar_lea.vmem %s491_s6, 128  ;;  %p836_p11 = scmp.lt.s32.totalorder %s491_s6, %s491_s6 }
  0x3a   :  { %86 = vst.msk [vmem:[#allocation3] sm:$0xff] %vm85_vm0, %v84_v2  ;;  %599 = vmatprep.mubr.msk.f32.mxu1 %vm866_vm1, %v865_v5  ;;  %168 = vperm.xlu1 %755, %v165_v7   ;;  %v175_v13 = vld [vmem:[#allocation4 + $0x18] sm:$0xff]  ;;  %v679_v17 = vpack.c.bf16 %v177_v16, %v176_v15  ;;  %v180_v21 = vld [vmem:[#allocation4 + $0x40] sm:$0xff]  ;;  %v181_v22 = vld [vmem:[#allocation4 + $0x48] sm:$0xff]  ;;  %p832_p10 = scmp.ne.s32.totalorder %s491_s6, %s831_s14  ;;  %p837_p12 = scmp.lt.s32.totalorder %s831_s14, %s831_s14 }
  0x3b   :  { %672 = vmatprep.subr.bf16.mxu1 %v867_v10  ;;  %696 = vmatprep.subr.bf16.mxu0 %v867_v10  ;;  %v676_v14 = vpack.c.bf16 %v175_v13, %v174_v12  ;;  %v179_v19 = vld [vmem:[#allocation4 + $0x38] sm:$0xff]  ;;  %v685_v23 = vpack.c.bf16 %v181_v22, %v180_v21  ;;  %v182_v24 = vld [vmem:[#allocation4 + $0x50] sm:$0xff]  ;;  %v184_v27 = vld [vmem:[#allocation4 + $0x60] sm:$0xff] }
  0x3c   :  { %99 = vperm.xlu0 %754, %v91_v4   ;;  %674 = vmatpush3.bf16.msra.mxu1 %v673_v11  ;;  %v682_v20 = vpack.c.bf16 %v179_v19, %v178_v18  ;;  %v183_v25 = vld [vmem:[#allocation4 + $0x58] sm:$0xff]  ;;  %v185_v28 = vld [vmem:[#allocation4 + $0x68] sm:$0xff]  ;;  %v186_v30 = vld [vmem:[#allocation4 + $0x70] sm:$0xff]  ;;  %p838_p13 = por %p837_p12, %p836_p11 }
  0x3d   :  { %675 = vmatprep.subr.bf16.mxu1 %v867_v10  ;;  %v688_v26 = vpack.c.bf16 %v183_v25, %v182_v24  ;;  %v691_v29 = vpack.c.bf16 %v185_v28, %v184_v27  ;;  %v187_v31 = vld [vmem:[#allocation4 + $0x78] sm:$0xff]  ;;  %v281_v44 = vld [vmem:[#allocation7] sm:$0xff]  ;;  %v282_v45 = vld [vmem:[#allocation7 + $0x8] sm:$0xff] }
  0x3e   :  { %v694_v32 = vpack.c.bf16 %v187_v31, %v186_v30  ;;  %v697_v46 = vpack.c.bf16 %v282_v45, %v281_v44  ;;  %v283_v47 = vld [vmem:[#allocation7 + $0x10] sm:$0xff]  ;;  %v284_v48 = vld [vmem:[#allocation7 + $0x18] sm:$0xff]  ;;  %v285_v50 = vld [vmem:[#allocation7 + $0x20] sm:$0xff]  ;;  %p839_p0 = pnand %p838_p13, %p832_p10 }
  0x3f   :  { %v700_v49 = vpack.c.bf16 %v284_v48, %v283_v47  ;;  %v286_v51 = vld [vmem:[#allocation7 + $0x28] sm:$0xff]  ;;  %v287_v53 = vld [vmem:[#allocation7 + $0x30] sm:$0xff]  ;;  %v288_v54 = vld [vmem:[#allocation7 + $0x38] sm:$0xff] }
  0x40   :  { %677 = vmatpush3.bf16.msra.mxu1 %v676_v14  ;;  %v703_v52 = vpack.c.bf16 %v286_v51, %v285_v50  ;;  %v706_v55 = vpack.c.bf16 %v288_v54, %v287_v53  ;;  %v289_v56 = vld [vmem:[#allocation7 + $0x40] sm:$0xff]  ;;  %v290_v57 = vld [vmem:[#allocation7 + $0x48] sm:$0xff]  ;;  %v291_v59 = vld [vmem:[#allocation7 + $0x50] sm:$0xff] }
  0x41   :  { %678 = vmatprep.subr.bf16.mxu1 %v867_v10  ;;  %v93_v34 = vld [vmem:[#allocation3] sm:$0xff]  ;;  %v709_v58 = vpack.c.bf16 %v290_v57, %v289_v56  ;;  %v293_v62 = vld [vmem:[#allocation7 + $0x60] sm:$0xff]  ;;  %v294_v63 = vld [vmem:[#allocation7 + $0x68] sm:$0xff] }
  0x42   :  { %v292_v60 = vld [vmem:[#allocation7 + $0x58] sm:$0xff]  ;;  %v715_v0 = vpack.c.bf16 %v294_v63, %v293_v62  ;;  %v295_v1 = vld [vmem:[#allocation7 + $0x70] sm:$0xff]  ;;  %v390_v24 = vld [vmem:[#allocation9] sm:$0xff] }
  0x43   :  { %v712_v61 = vpack.c.bf16 %v292_v60, %v291_v59  ;;  %v296_v2 = vld [vmem:[#allocation7 + $0x78] sm:$0xff]  ;;  %v391_v25 = vld [vmem:[#allocation9 + $0x8] sm:$0xff]  ;;  %v392_v27 = vld [vmem:[#allocation9 + $0x10] sm:$0xff] }
  0x44   :  { %680 = vmatpush3.bf16.msra.mxu1 %v679_v17  ;;  %v718_v3 = vpack.c.bf16 %v296_v2, %v295_v1  ;;  %v503_v4 = vld [vmem:[%s1050_s5] ss:$0 sm:$0xff]  ;;  %v394_v30 = vld [vmem:[#allocation9 + $0x20] sm:$0xff]  ;;  %v395_v31 = vld [vmem:[#allocation9 + $0x28] sm:$0xff] }
  0x45   :  { %681 = vmatprep.subr.bf16.mxu1 %v867_v10  ;;  %v393_v28 = vld [vmem:[#allocation9 + $0x18] sm:$0xff]  ;;  %v404_v45 = vld [vmem:[#allocation9 + $0x70] sm:$0xff] }
  0x46   :  { %v505_v48 = vld [vmem:[%s1052_s7] ss:$0 sm:$0xff] }
  0x47   :  { %v507_v2 = vld [vmem:[%s1054_s9] ss:$0 sm:$0xff] }
  0x48   :  { %683 = vmatpush3.bf16.msra.mxu1 %v682_v20 }
  0x49   :  { %684 = vmatprep.subr.bf16.mxu1 %v867_v10 }
  0x4c   :  { %686 = vmatpush3.bf16.msra.mxu1 %v685_v23 }
  0x4d   :  { %687 = vmatprep.subr.bf16.mxu1 %v867_v10 }
  0x50   :  { %689 = vmatpush3.bf16.msra.mxu1 %v688_v26  ;;  %v721_v26 = vpack.c.bf16 %v391_v25, %v390_v24 }
  0x51   :  { %690 = vmatprep.subr.bf16.mxu1 %v867_v10 }
  0x54   :  { %692 = vmatpush3.bf16.msra.mxu1 %v691_v29  ;;  %v724_v29 = vpack.c.bf16 %v393_v28, %v392_v27 }
  0x55   :  { %693 = vmatprep.subr.bf16.mxu1 %v867_v10 }
  0x58   :  { %695 = vmatpush3.bf16.msra.mxu1 %v694_v32  ;;  %v727_v32 = vpack.c.bf16 %v395_v31, %v394_v30 }
  0x59   :  { %720 = vmatprep.subr.bf16.mxu1 %v867_v10 }
  0xb7   :  { %v96_v33 = vpop.permute.xlu0 %95 }
  0xb8   :  { %vm97_vm2 = vcmp.ge.s32.totalorder %v93_v34, %v96_v33  ;;  %v396_v33 = vld [vmem:[#allocation9 + $0x30] sm:$0xff] }
  0xb9   :  { %v169_v38 = vpop.permute.xlu1 %168 }
  0xbb   :  { %v100_v35 = vpop.permute.xlu0 %99 }
  0xbc   :  { %vm101_vm3 = vcmp.lt.s32.totalorder %v93_v34, %v100_v35  ;;  %v397_v34 = vld [vmem:[#allocation9 + $0x38] sm:$0xff] }
  0xbd   :  { %vm102_vm4 = vmand %vm97_vm2, %vm101_vm3  ;;  %v730_v35 = vpack.c.bf16 %v397_v34, %v396_v33 }
  0xbe   :  { %v500_v36 = vsel %vm102_vm4, 1.0, %v865_v5 }
  0xbf   :  { %v105_v37 = vpack.c.bf16 %v500_v36, %v500_v36  ;;  %v398_v36 = vld [vmem:[#allocation9 + $0x40] sm:$0xff] }
  0xc1   :  { %564 = vmatmul.mubr.msk.bf16.vlgmr.msra.gmra.mrb[0].mxu0 %vm85_vm0, %v105_v37  ;;  %v399_v37 = vld [vmem:[#allocation9 + $0x48] sm:$0xff] }
  0xc2   :  { %634 = vmatprep.mubr.msk.f32.mxu0 %vm866_vm1, %v865_v5  ;;  %698 = vmatpush3.bf16.msra.mxu0 %v697_v46  ;;  %v405_v46 = vld [vmem:[#allocation9 + $0x78] sm:$0xff] }
  0xc3   :  { %699 = vmatprep.subr.bf16.mxu0 %v867_v10  ;;  %v742_v47 = vpack.c.bf16 %v405_v46, %v404_v45 }
  0xc6   :  { %701 = vmatpush3.bf16.msra.mxu0 %v700_v49 }
  0xc7   :  { %702 = vmatprep.subr.bf16.mxu0 %v867_v10 }
  0xca   :  { %704 = vmatpush3.bf16.msra.mxu0 %v703_v52 }
  0xcb   :  { %705 = vmatprep.subr.bf16.mxu0 %v867_v10 }
  0xce   :  { %707 = vmatpush3.bf16.msra.mxu0 %v706_v55 }
  0xcf   :  { %708 = vmatprep.subr.bf16.mxu0 %v867_v10 }
  0xd2   :  { %710 = vmatpush3.bf16.msra.mxu0 %v709_v58 }
  0xd3   :  { %711 = vmatprep.subr.bf16.mxu0 %v867_v10 }
  0xd6   :  { %713 = vmatpush3.bf16.msra.mxu0 %v712_v61 }
  0xd7   :  { %714 = vmatprep.subr.bf16.mxu0 %v867_v10 }
  0xda   :  { %716 = vmatpush3.bf16.msra.mxu0 %v715_v0 }
  0xdb   :  { %717 = vmatprep.subr.bf16.mxu0 %v867_v10 }
  0xde   :  { %719 = vmatpush3.bf16.msra.mxu0 %v718_v3 }
 0x194   :  { %v153_v39 = vpop.f32.mrb[0].mxu0 }
 0x195   :  { %v171_v40 = vmul.f32 %v169_v38, %v153_v39  ;;  %v565_v41 = vpop.f32.mrb[1].mxu0  ;;  %v733_v38 = vpack.c.bf16 %v399_v37, %v398_v36  ;;  %v400_v39 = vld [vmem:[#allocation9 + $0x50] sm:$0xff] }
 0x196   :  { %v156_v42 = vpop.f32.mrb[2].mxu0 }
 0x197   :  { %v566_v43 = vpop.f32.mrb[3].mxu0  ;;  %600 = vmatmul.mubr.f32.vlgmr.msra.gmra.mrb[0].mxu1 %v171_v40  ;;  %v401_v40 = vld [vmem:[#allocation9 + $0x58] sm:$0xff]  ;;  %v402_v42 = vld [vmem:[#allocation9 + $0x60] sm:$0xff] }
 0x198   :  { %669 = vmatprep.mubr.msk.f32.mxu1 %vm866_vm1, %v865_v5  ;;  %722 = vmatpush3.bf16.msra.mxu1 %v721_v26  ;;  %v736_v41 = vpack.c.bf16 %v401_v40, %v400_v39  ;;  %v403_v43 = vld [vmem:[#allocation9 + $0x68] sm:$0xff] }
 0x199   :  { %723 = vmatprep.subr.bf16.mxu1 %v867_v10  ;;  %v739_v44 = vpack.c.bf16 %v403_v43, %v402_v42 }
 0x19c   :  { %725 = vmatpush3.bf16.msra.mxu1 %v724_v29 }
 0x19d   :  { %726 = vmatprep.subr.bf16.mxu1 %v867_v10 }
 0x1a0   :  { %728 = vmatpush3.bf16.msra.mxu1 %v727_v32 }
 0x1a1   :  { %729 = vmatprep.subr.bf16.mxu1 %v867_v10 }
 0x1a4   :  { %731 = vmatpush3.bf16.msra.mxu1 %v730_v35 }
 0x1a5   :  { %732 = vmatprep.subr.bf16.mxu1 %v867_v10 }
 0x1a8   :  { %734 = vmatpush3.bf16.msra.mxu1 %v733_v38 }
 0x1a9   :  { %735 = vmatprep.subr.bf16.mxu1 %v867_v10 }
 0x1ac   :  { %737 = vmatpush3.bf16.msra.mxu1 %v736_v41 }
 0x1ad   :  { %738 = vmatprep.subr.bf16.mxu1 %v867_v10 }
 0x1b0   :  { %740 = vmatpush3.bf16.msra.mxu1 %v739_v44 }
 0x1b1   :  { %741 = vmatprep.subr.bf16.mxu1 %v867_v10 }
 0x1b4   :  { %743 = vmatpush3.bf16.msra.mxu1 %v742_v47 }
 0x26a   :  { %v261_v5 = vpop.f32.mrb[0].mxu1 }
 0x26b   :  { %v262_v6 = vadd.f32 %v503_v4, %v261_v5  ;;  %v601_v7 = vpop.f32.mrb[1].mxu1 }
 0x26d   :  { %v266_v8 = vand.u32 2147483647, %v262_v6  ;;  %v265_v20 = vmax.f32 %v262_v6, 0.0 }
 0x26f   :  { %v267_v9 = vsub.f32 0.0, %v266_v8 }
 0x271   :  { %v268_v11 = vmul.f32 1.442695, %v267_v9 }
 0x273   :  { %757 = vpow2.f32 %v268_v11 }
 0x27d   :  { %v758_v12 = vpop.eup %757 }
 0x27e   :  { %v270_v13 = vadd.f32 1.0, %v758_v12  ;;  %v273_v14 = vmul.f32 -0.5, %v758_v12  ;;  %v276_v16 = vand.u32 2147483647, %v758_v12 }
 0x280   :  { %759 = vlog2.f32 %v270_v13  ;;  %v274_v15 = vadd.f32 1.0, %v273_v14  ;;  %vm277_vm5 = vcmp.lt.f32.partialorder %v276_v16, 0.0004427343 }
 0x282   :  { %v275_v19 = vmul.f32 %v758_v12, %v274_v15 }
 0x28a   :  { %v760_v17 = vpop.eup %759 }
 0x28b   :  { %v272_v18 = vmul.f32 0.6931472, %v760_v17 }
 0x28d   :  { %v278_v21 = vsel %vm277_vm5, %v275_v19, %v272_v18 }
 0x28e   :  { %v279_v22 = vadd.f32 %v278_v21, %v265_v20 }
 0x290   :  { %v504_v23 = vadd.f32 -0.6931472, %v279_v22 }
 0x292   :  { %635 = vmatmul.mubr.f32.vlgmr.msra.gmra.mrb[4].mxu0 %v504_v23 }
 0x365   :  { %v370_v49 = vpop.f32.mrb[4].mxu0 }
 0x366   :  { %v371_v50 = vadd.f32 %v505_v48, %v370_v49  ;;  %v636_v51 = vpop.f32.mrb[5].mxu0 }
 0x368   :  { %v375_v52 = vand.u32 2147483647, %v371_v50  ;;  %v374_v62 = vmax.f32 %v371_v50, 0.0 }
 0x36a   :  { %v376_v53 = vsub.f32 0.0, %v375_v52 }
 0x36c   :  { %v377_v54 = vmul.f32 1.442695, %v376_v53 }
 0x36e   :  { %761 = vpow2.f32 %v377_v54 }
 0x378   :  { %v762_v55 = vpop.eup %761 }
 0x379   :  { %v379_v56 = vadd.f32 1.0, %v762_v55  ;;  %v382_v57 = vmul.f32 -0.5, %v762_v55  ;;  %v385_v58 = vand.u32 2147483647, %v762_v55 }
 0x37b   :  { %763 = vlog2.f32 %v379_v56  ;;  %v383_v10 = vadd.f32 1.0, %v382_v57  ;;  %vm386_vm6 = vcmp.lt.f32.partialorder %v385_v58, 0.0004427343 }
 0x37d   :  { %v384_v61 = vmul.f32 %v762_v55, %v383_v10 }
 0x385   :  { %v764_v59 = vpop.eup %763 }
 0x386   :  { %v381_v60 = vmul.f32 0.6931472, %v764_v59 }
 0x388   :  { %v387_v63 = vsel %vm386_vm6, %v384_v61, %v381_v60 }
 0x389   :  { %v388_v0 = vadd.f32 %v387_v63, %v374_v62 }
 0x38b   :  { %v506_v1 = vadd.f32 -0.6931472, %v388_v0 }
 0x38d   :  { %670 = vmatmul.mubr.f32.vlgmr.msra.gmra.mrb[2].mxu1 %v506_v1 }
 0x460   :  { %v479_v3 = vpop.f32.mrb[2].mxu1 }
 0x461   :  { %v480_v4 = vadd.f32 %v507_v2, %v479_v3  ;;  %v671_v5 = vpop.f32.mrb[3].mxu1 }
 0x463   :  { %483 = vst [vmem:[#allocation10] sm:$0xff] %v480_v4 }
 0x464   :  { %842 = shalt.err (!%p839_p0)
}
 0x465   :  { %s843_s21 = scalar_lea.hbm %s1055_s10, 128 }
 0x466   :  { %p844_p1 = scmp.ne.s32.totalorder %s1055_s10, %s843_s21  ;;  %p847_p2 = scmp.lt.u32.totalorder %s843_s21, %s1055_s10 }
 0x468   :  { %p849_p3 = pnand %p847_p2, %p844_p1 }
 0x46a   :  { %852 = shalt.err (!%p849_p3)
}
 0x46b   :  { %493 = dma.vmem_to_hbm [thread:$0]  %s491_s6, 128, %s1055_s10, [#allocation6]  }
 0x46c   :  { %857 = dma.done.wait [#allocation6], 128  }
 0x46d   :  { %858 = vsyncadd [#allocation6], 4294967168 }
 0x46e   :  { %497 = vsyncpa [#allocation5], 1 }
 0x46f   :  { %498 = vsyncpa [#allocation8], 1 }
 0x470   :  { %499 = vsyncpa [#allocation6], 1 }

</bundles_post_ra>
